<compile_context>
chip_gen: v7x
topology: tpu7x:2x2x1
jax: 0.10.0
libtpu: 0.0.40
codegen_flags: <defaults>
</compile_context>

<pallas_src>
import jax
import jax.numpy as jnp
from jax.experimental import pallas as pl
from jax.experimental.pallas import tpu as pltpu


_LANE = 128                      # full lane width -> contiguous, unmasked stores
_TARGET_BLOCK_BYTES = 4 << 20    # ~4 MiB per block, independent of grad dtype


# ------------------------------ Pallas kernel -------------------------------


def _neg_scale_kernel(neg_alpha_ref, g_ref, o_ref):
    """o = (-alpha) * g for one VMEM tile.  -alpha is an f32 scalar in SMEM."""
    na = neg_alpha_ref[0]
    g = g_ref[...]
    if o_ref.dtype == jnp.float32:
        o_ref[...] = g * na
    else:
        # Low-precision grads: compute in f32 (v5e has no bf16 VPU), cast back.
        o_ref[...] = (g.astype(jnp.float32) * na).astype(o_ref.dtype)


# ------------------------------ tiling plan ----------------------------------


def _round_up(x, m):
    return -(-x // m) * m


def _as_2d(g):
    """Copy-free 2-D view of the gradient (no jnp.pad, no extra HBM pass)."""
    total = g.size
    if total % _LANE == 0:
        return g.reshape(total // _LANE, _LANE)        # lane-dense fast path
    if g.ndim >= 2:
        return g.reshape(-1, g.shape[-1])              # natural last dim, no pad
    return g.reshape(1, total)                         # tiny ragged 0-D/1-D grads
    # TODO(synk): a huge 1-D gradient whose size is not a multiple of 128 would
    # make this single block over-wide; not reachable for this module's usage.


def _plan_tile_rows(rows, cols, dtype):
    """Dtype-aware row tile: ~4 MiB blocks, >= 2 grid steps for v7x megacore."""
    itemsize = dtype.itemsize
    pack = max(8, 32 // itemsize)                      # f32: 8, bf16: 16, int8: 32
    row_bytes = cols * itemsize
    tile_rows = max(pack, (_TARGET_BLOCK_BYTES // row_bytes) // pack * pack)
    # Keep at least two (balanced) grid steps so both v7x TensorCores get work.
    half_rows = _round_up(-(-rows // 2), pack)
    tile_rows = min(tile_rows, max(half_rows, pack))
    if tile_rows >= rows:
        tile_rows = rows                               # single full-extent block
    return tile_rows


def _neg_scale_pallas(alpha, g):
    """grad_in = -alpha * grad_out as a tiled, pipelined, donated Pallas kernel."""
    if g.size == 0:
        return g

    g2d = _as_2d(g)
    rows, cols = g2d.shape
    tile_rows = _plan_tile_rows(rows, cols, g2d.dtype)
    grid = pl.cdiv(rows, tile_rows)          # ragged tail row-block handled by Pallas

    # Precompute -alpha; keep it f32 in SMEM regardless of the gradient dtype.
    neg_alpha = (-jnp.asarray(alpha, dtype=jnp.float32)).reshape((1,))

    out2d = pl.pallas_call(
        _neg_scale_kernel,
        out_shape=jax.ShapeDtypeStruct(g2d.shape, g2d.dtype),
        grid=(grid,),
        in_specs=[
            pl.BlockSpec(memory_space=pltpu.SMEM),              # -alpha scalar
            pl.BlockSpec((tile_rows, cols), lambda i: (i, 0)),  # grad tile
        ],
        out_specs=pl.BlockSpec((tile_rows, cols), lambda i: (i, 0)),
        input_output_aliases={1: 0},                            # donate grad buffer
        compiler_params=pltpu.CompilerParams(
            dimension_semantics=("parallel",),
            vmem_limit_bytes=32 << 20,   # 4 MiB blocks, double-buffered in+out,
        ),                               # safe on v5e/v6e/v7x with this limit
    )(neg_alpha, g2d)

    return out2d.reshape(g.shape)


# ------------------------- custom_vjp (grad reversal) ------------------------


@jax.custom_vjp
def grad_reverse(x, alpha):
    # Forward is a pure identity: no kernel, no HBM traffic.
    return x


def _grad_reverse_fwd(x, alpha):
    return x, alpha


def _grad_reverse_bwd(alpha, g):
    # grad wrt x = -alpha * g (Pallas kernel); alpha is non-differentiable —
    # PyTorch returns None, zeros is the JAX-safe equivalent.
    return (_neg_scale_pallas(alpha, g), jnp.zeros_like(alpha))


grad_reverse.defvjp(_grad_reverse_fwd, _grad_reverse_bwd)


class GradientReversal:
    """JAX/Pallas equivalent of the PyTorch GradientReversal module."""

    def __init__(self, alpha):
        # alpha is a non-trainable scalar "parameter".
        self.alpha = jnp.asarray(alpha, dtype=jnp.float32)

    def __call__(self, x):
        return grad_reverse(x, self.alpha)


# --------------------------------- main --------------------------------------


if __name__ == "__main__":
    key = jax.random.PRNGKey(0)
    module = GradientReversal(alpha=0.5)

    # ---- lane-dense path: NCHW input, batch=2, channels=4, spatial=16x16 ----
    x = jax.random.normal(key, (2, 4, 16, 16), dtype=jnp.float32)

    # Forward: pure identity (no kernel).
    y = jax.block_until_ready(module(x))
    assert y.shape == x.shape and y.dtype == x.dtype
    assert bool(jnp.allclose(y, x)), "forward must be identity"

    # Backward: exercises the tiled Pallas -alpha*g kernel (2048 elems -> (16,128)).
    loss_fn = lambda inp: jnp.sum(module(inp) * 2.0)
    g = jax.block_until_ready(jax.grad(loss_fn)(x))
    # expected grad: -alpha * d(sum(2*y))/dy = -0.5 * 2 = -1.0 everywhere
    assert bool(jnp.allclose(g, -1.0 * jnp.ones_like(x))), "reversed grad mismatch"

    # ---- non-lane-dense path: size not a multiple of 128, no padding used ----
    x2 = jax.random.normal(jax.random.PRNGKey(1), (4, 3, 4, 7), dtype=jnp.float32)
    loss_fn2 = lambda inp: jnp.sum(module(inp) * 3.0)
    g2 = jax.block_until_ready(jax.grad(loss_fn2)(x2))
    # expected grad: -0.5 * 3 = -1.5 everywhere
    assert bool(jnp.allclose(g2, -1.5 * jnp.ones_like(x2))), "ragged-path grad mismatch"

    print("KERNEL_OK")
</pallas_src>

<mosaic_0001>
module attributes {stable_mosaic.version = 11 : i64} {
  func.func @_neg_scale_kernel(%arg0: i32, %arg1: memref<1xf32, #tpu.memory_space<smem>>, %arg2: memref<8x128xf32, #tpu.memory_space<vmem>>, %arg3: memref<8x128xf32, #tpu.memory_space<vmem>>) attributes {dimension_semantics = [#tpu.dimension_semantics<parallel>], iteration_bounds = array<i64: 2>, scalar_prefetch = 0 : i64, scratch_operands = 0 : i64, tpu.core_type = #tpu.core_type<tc>, window_params = [{transform_indices = @transform_0, window_bounds = array<i64: 1>}, {transform_indices = @transform_1, window_bounds = array<i64: 8, 128>}, {transform_indices = @transform_2, window_bounds = array<i64: 8, 128>}]} {
    %c0 = arith.constant 0 : index
    %0 = memref.load %arg1[%c0] : memref<1xf32, #tpu.memory_space<smem>>
    %c0_0 = arith.constant 0 : index
    %c0_1 = arith.constant 0 : index
    %1 = vector.load %arg2[%c0_0, %c0_1] : memref<8x128xf32, #tpu.memory_space<vmem>>, vector<8x128xf32>
    %2 = vector.broadcast %0 : f32 to vector<8x128xf32>
    %3 = arith.mulf %1, %2 : vector<8x128xf32>
    %c0_2 = arith.constant 0 : index
    %c0_3 = arith.constant 0 : index
    %4 = vector.load %arg3[%c0_2, %c0_3] : memref<8x128xf32, #tpu.memory_space<vmem>>, vector<8x128xf32>
    tpu.vector_store %arg3[%c0_2, %c0_3], %3 {strides = array<i32>} : memref<8x128xf32, #tpu.memory_space<vmem>>, vector<8x128xf32>,
    return
  }
  func.func @transform_0(%arg0: i32) -> i32 {
    %c0_i32 = arith.constant 0 : i32
    %c0_i32_0 = arith.constant 0 : i32
    return %c0_i32 : i32
  }
  func.func @transform_1(%arg0: i32) -> (i32, i32) {
    %c0_i32 = arith.constant 0 : i32
    %c0_i32_0 = arith.constant 0 : i32
    return %arg0, %c0_i32 : i32, i32
  }
  func.func @transform_2(%arg0: i32) -> (i32, i32) {
    %c0_i32 = arith.constant 0 : i32
    %c0_i32_0 = arith.constant 0 : i32
    return %arg0, %c0_i32 : i32, i32
  }
}

</mosaic_0001>

<bundles_post_ra>
// kernel: tpu_custom_call.1
= control target key start
LH: loop header
LB: loop body
LE: loop exit
PB: predicated region body
PF: predicated region fallthrough
CT: control target
= control target key end

     0   :  { %s586_s0 = inlined_call_operand.<no memory space> [shape: f32[1], index: 0, kind: input, shape index: {}]   ;;  %s587_s1 = inlined_call_operand.hbm [shape: f32[16,128], index: 1, kind: input, shape index: {}, may-alias: {1,2}]   ;;  %s588_s2 = inlined_call_operand.hbm [shape: f32[16,128], index: 2, kind: output, shape index: {}, may-alias: {1,2}]  }
   0x1   :  { %7 = sst [smem:[#allocation2]] %s586_s0 }
   0x2   :  { %8 = vsyncpa [#allocation4], 0 }
   0x3   :  { %10 = vsyncpa [#allocation4 + $0x1], 0 }
   0x4   :  { %11 = vsyncpa [#allocation5], 0 }
   0x5   :  { %13 = vsyncpa [#allocation5 + $0x1], 0  ;;  %s425_s11 = smov 0   ;;  %s427_s12 = smov 0  }
   0x6   :  { %s429_s13 = smov 0   ;;  %s431_s14 = smov 0  }
   0x7 LB: > { %s446_s0 = sadd.s32 4294967295, %s403_s14   ;;  %s249_s15 = sadd.s32 4294967294, %s403_s14   ;;  %s403_s14 = sphi %s431_s14, %s603_s14   ;;  %s399_s13 = sphi %s429_s13, %s602_s13   ;;  %s395_s12 = sphi %s427_s12, %s601_s12   ;;  %s391_s11 = sphi %s425_s11, %s600_s11  }
   0x8   : > { %s450_s16 = sadd.s32 1, %s403_s14   ;;  %s47_s17 = sadd.s32 1, %s399_s13 }
   0x9   : > { %s44_s18 = ssub.s32 %s403_s14, %s450_s16  ;;  %p54_p0 = scmp.ne.s32.totalorder %s399_s13, %s395_s12 }
   0xa   : > { %p45_p1 = scmp.eq.s32.totalorder %s44_s18, 0  ;;  %p55_p2 = scmp.eq.s32.totalorder %s403_s14, 0 }
   0xb   : > { %p60_p3 = scmp.ne.s32.totalorder %s395_s12, %s391_s11  ;;  %p61_p4 = scmp.eq.s32.totalorder %s446_s0, 0 }
   0xc   : > { %s462_s19 = scalar_select %p45_p1, %s399_s13, %s47_s17  }
   0xd   : > { %p464_p5 = por %p55_p2, %p54_p0  ;;  %p468_p6 = por %p61_p4, %p60_p3 }
   0xe   : > { %p84_p7 = scmp.eq.s32.totalorder %s446_s0, 1  ;;  %p90_p8 = scmp.eq.s32.totalorder %s249_s15, 1 }
   0xf   : > { %p273_p10 = scmp.lt.s32.totalorder %s403_s14, 2  ;;  %s113_s24 = sand.u32 1, %s399_s13  }
  0x10   : > { %p475_p11 = por %p84_p7, %p54_p0  ;;  %p479_p12 = por %p90_p8, %p60_p3 }
  0x11   : > { %s253_s25 = sshll.u32 %s403_s14, 7  ;;  %s252_s26 = sshll.u32 %s113_s24, 3 }
  0x12   : > { %s592_s22 = scalar_select %p475_p11, 1, 0 }
  0x13   : > { %s593_s23 = scalar_select %p479_p12, 1, 0 }
  0x14   : > { %s488_s29 = scalar_lea.hbm %s587_s1, %s253_s25  ;;  %s117_s30 = scalar_lea.vmem [#allocation3], %s252_s26 }
  0x15   : > { %s124_s3 = sshll.u32 %s117_s30, 4  ;;  %p492_p13 = pnand %p273_p10, %p464_p5  ;;  %s496_s3 = int_to_ptr.vmem [resolvable:$true] %s124_s3 }
  0x16   : > { %s114_s5 = scalar_lea.sflag [#allocation4], %s113_s24  ;;  %s307_s6 = scalar_lea.hbm %s488_s29, 128 }
  0x17   : > { %p308_p2 = scmp.ne.s32.totalorder %s488_s29, %s307_s6  ;;  %p309_p3 = pneg %p492_p13 }
  0x18   : > { %s312_s9 = scalar_lea.hbm %s587_s1, 256  ;;  %p313_p5 = scmp.lt.u32.totalorder %s488_s29, %s587_s1 }
  0x19   : > { %p310_p4 = pnand %p309_p3, %p308_p2  ;;  %p314_p8 = scmp.lt.u32.totalorder %s312_s9, %s307_s6 }
  0x1a   : > { %p316_p9 = scmp.lt.u32.totalorder %s307_s6, %s488_s29 }
  0x1b   : > { %p311_p7 = pneg %p310_p4  ;;  %p315_p10 = por %p314_p8, %p313_p5 }
  0x1d   : > { %p317_p0 = por %p316_p9, %p315_p10 }
  0x1f   : > { %p318_p1 = pnand %p317_p0, %p311_p7 }
  0x21   : > { %321 = shalt.err (!%p318_p1)
}
  0x22   : > { %s322_s17 = scalar_lea.vmem %s496_s3, 128  ;;  %s405_s18 = smov [#allocation3]  }
  0x23   : > { %p323_p2 = scmp.ne.s32.totalorder %s496_s3, %s322_s17  ;;  %s327_s20 = sshll.u32 %s405_s18, 4  ;;  %s328_s20 = int_to_ptr.vmem [resolvable:$false] %s327_s20 }
  0x24   : > { %s329_s24 = scalar_lea.vmem %s328_s20, 256  ;;  %p330_p11 = scmp.lt.s32.totalorder %s496_s3, %s328_s20 }
  0x25   : > { %p325_p4 = pnand %p323_p2, %p309_p3  ;;  %p331_p5 = scmp.lt.s32.totalorder %s329_s24, %s322_s17 }
  0x27   : > { %p326_p12 = pneg %p325_p4  ;;  %p332_p8 = por %p331_p5, %p330_p11 }
  0x29   : > { %p333_p9 = pnand %p332_p8, %p326_p12 }
  0x2b   : > { %336 = shalt.err (!%p333_p9)
}
  0x2c   : > { %268 = dma.hbm_to_vmem [thread:$0]  (!%p492_p13), %s488_s29, 128, %s496_s3, %s114_s5  }
  0x2d   : > { %p595_p0 = scmp.lt.s32.totalorder %s403_s14, 3  ;;  %p596_p1 = scmp.ge.s32.totalorder %s403_s14, 1 }
  0x2f   : > { %p130_p3 = pnand %p596_p1, %p595_p0 }
  0x30   : > { %s530_s25 = sand.u32 (!%p130_p3), 1, %s395_s12  }
  0x31   : > { %133 = sbr.rel (%p130_p3) target bundleno = 83 (0x53), region = 28  ;;  %s255_s26 = sshll.u32 (!%p130_p3), %s530_s25, 3 }
  0x32   : > { %s136_s27 = scalar_lea.sflag (!%p130_p3), [#allocation4], %s530_s25  ;;  %s139_s28 = scalar_lea.vmem (!%p130_p3), [#allocation3], %s255_s26 }
  0x38   : > { %382 = dma.done.wait (%p468_p6), %s136_s27, 128  }
  0x39   : > { %384 = vsyncadd (%p468_p6), %s136_s27, 4294967168  ;;  %s160_s29 = sld [smem:[#allocation2]]  ;;  %s159_s30 = scalar_lea.vmem [#allocation6], %s255_s26  ;;  %v161_v0 = vld [vmem:[%s139_s28] sm:$0xff] }
  0x3a   : > { %s179_s3 = sshll.u32 %s159_s30, 4  ;;  %s258_s4 = sshll.u32 %s446_s0, 7  ;;  %s539_s3 = int_to_ptr.vmem [resolvable:$true] %s179_s3 }
  0x3b   : > { %s544_s21 = scalar_lea.hbm %s588_s2, %s258_s4  ;;  %s166_s7 = scalar_lea.sflag [#allocation5], %s530_s25 }
  0x3c   : > { %s337_s8 = scalar_lea.vmem %s539_s3, 128  ;;  %p597_p11 = scmp.ne.s32.totalorder %s592_s22, 0 }
  0x3d   : > { %p338_p6 = scmp.ne.s32.totalorder %s539_s3, %s337_s8  ;;  %s406_s0 = smov [#allocation6]  }
  0x3e   : > { %s341_s9 = sshll.u32 %s406_s0, 4  ;;  %s342_s9 = int_to_ptr.vmem [resolvable:$false] %s341_s9 }
  0x3f   : > { %v162_v1 = vstv %s160_s29  ;;  %p339_p12 = pnand %p338_p6, %p597_p11  ;;  %s343_s10 = scalar_lea.vmem %s342_s9, 256 }
  0x40   : > { %v163_v2 = vmul.f32 %v162_v1, %v161_v0  ;;  %p344_p7 = scmp.lt.s32.totalorder %s539_s3, %s342_s9  ;;  %p345_p10 = scmp.lt.s32.totalorder %s343_s10, %s337_s8 }
  0x41   : > { %p340_p13 = pneg %p339_p12 }
  0x42   : > { %164 = vst [vmem:[%s159_s30] sm:$0xff] %v163_v2  ;;  %p346_p2 = por %p345_p10, %p344_p7 }
  0x44   : > { %p347_p4 = pnand %p346_p2, %p340_p13 }
  0x46   : > { %350 = shalt.err (!%p347_p4)
}
  0x47   : > { %s351_s15 = scalar_lea.hbm %s544_s21, 128  ;;  %s355_s20 = scalar_lea.hbm %s588_s2, 256 }
  0x48   : > { %p352_p5 = scmp.ne.s32.totalorder %s544_s21, %s351_s15  ;;  %p356_p0 = scmp.lt.u32.totalorder %s544_s21, %s588_s2 }
  0x49   : > { %p357_p1 = scmp.lt.u32.totalorder %s355_s20, %s351_s15  ;;  %p359_p6 = scmp.lt.u32.totalorder %s351_s15, %s544_s21 }
  0x4a   : > { %p353_p8 = pnand %p352_p5, %p597_p11 }
  0x4b   : > { %p358_p3 = por %p357_p1, %p356_p0 }
  0x4c   : > { %p354_p9 = pneg %p353_p8 }
  0x4d   : > { %p360_p12 = por %p359_p6, %p358_p3 }
  0x4f   : > { %p361_p13 = pnand %p360_p12, %p354_p9 }
  0x51   : > { %364 = shalt.err (!%p361_p13)
}
  0x52   : > { %263 = dma.vmem_to_hbm [thread:$0]  (%p597_p11), %s539_s3, 128, %s544_s21, %s166_s7  }
  0x53 PF: > { %s191_s26 = sand.u32 1, %s391_s11   ;;  %p598_p7 = scmp.ne.s32.totalorder %s593_s23, 0 }
  0x54   : > { %p599_p10 = scmp.ge.s32.totalorder %s403_s14, 2  ;;  %s192_s27 = scalar_lea.sflag [#allocation5], %s191_s26 }
  0x56   : > { %p270_p2 = pnand %p599_p10, %p598_p7 }
  0x58   : > { %386 = dma.done.wait (!%p270_p2), %s192_s27, 128  }
  0x59   : > { %388 = vsyncadd (!%p270_p2), %s192_s27, 4294967168  ;;  %p16_p4 = scmp.ge.s32.totalorder %s450_s16, 4   ;;  %s600_s11 = smov %s395_s12 }
  0x5a   : > { %s601_s12 = smov %s399_s13  ;;  %s602_s13 = smov %s462_s19 }
  0x5b   : > { %s603_s14 = smov %s450_s16  ;;  %18 = sbr.rel (!%p16_p4) target bundleno = 7 (0x7), region = 73 }
  0x62   :  { %197 = vsyncpa [#allocation4], 1 }
  0x63   :  { %199 = vsyncpa [#allocation4 + $0x1], 1 }
  0x64   :  { %200 = vsyncpa [#allocation5], 1 }
  0x65   :  { %202 = vsyncpa [#allocation5 + $0x1], 1 }

</bundles_post_ra>
